<compile_context>
chip_gen: v7x
topology: tpu7x:2x2x1
jax: 0.10.0
libtpu: 0.0.40
codegen_flags: <defaults>
</compile_context>

<pallas_src>
import jax
import jax.numpy as jnp
from jax.experimental import pallas as pl
from jax.experimental.pallas import tpu as pltpu

_LANE = 128
_DEFAULT_MAX_BLOCK_LANES = 131072   # ~12 MiB moved per grid step (f32 + i32)


def _round_up(x, m):
    return ((x + m - 1) // m) * m


def _largest_divisor_leq(m, cap):
    cap = max(1, min(cap, m))
    for d in range(cap, 0, -1):
        if m % d == 0:
            return d
    return 1


def _sigmoid(x):
    # 0.5*(tanh(x/2)+1): a single EUP transcendental per element
    # (exp + reciprocal would be two and EUP-bind on v7x).
    return 0.5 * jnp.tanh(0.5 * x) + 0.5


def _dice_partial_kernel(p_bg_ref, p_fg_ref, tgt_ref, out_ref):
    """Accumulate per-row dice partial sums.

    p_bg_ref, p_fg_ref : (TN, THW) logits for channel 0 / channel 1
    tgt_ref            : (TN, THW) labels (0 = bg, 1 = fg, other = ignored)
    out_ref            : (1, TN, 4) resident accumulator over the j axis:
                         [:, :, 0] = sum(p_bg^2) + sum(t_bg)
                         [:, :, 1] = sum(t_bg * p_bg)
                         [:, :, 2] = sum(p_fg^2) + sum(t_fg)
                         [:, :, 3] = sum(t_fg * p_fg)
    """
    j = pl.program_id(2)

    @pl.when(j == 0)
    def _init():
        out_ref[...] = jnp.zeros_like(out_ref)

    p_bg = _sigmoid(p_bg_ref[...].astype(jnp.float32))
    p_fg = _sigmoid(p_fg_ref[...].astype(jnp.float32))

    t = tgt_ref[...]
    f_bg = (t == 0).astype(jnp.float32)
    f_fg = (t == 1).astype(jnp.float32)

    # Labels are {0,1} (anything else counts toward neither class, matching the
    # reference), so sum(t^2) == sum(t) == sum(mask).
    den_bg = jnp.sum(p_bg * p_bg + f_bg, axis=-1, keepdims=True)   # (TN, 1)
    num_bg = jnp.sum(f_bg * p_bg, axis=-1, keepdims=True)
    den_fg = jnp.sum(p_fg * p_fg + f_fg, axis=-1, keepdims=True)
    num_fg = jnp.sum(f_fg * p_fg, axis=-1, keepdims=True)

    # Direct slice stores (no concatenate in the epilogue).
    out_ref[0, :, 0:1] += den_bg
    out_ref[0, :, 1:2] += num_bg
    out_ref[0, :, 2:3] += den_fg
    out_ref[0, :, 3:4] += num_fg


def weighted_dice_loss_pallas(prediction, target_seg,
                              weighted_val: float = 1.0,
                              reduction: str = "sum",
                              eps: float = 1e-8,
                              max_block_lanes: int = _DEFAULT_MAX_BLOCK_LANES,
                              force_hw_split=None):
    """Pallas implementation of weighted_dice_loss forward.

    prediction: (N, 2, H, W) float logits (f32 or bf16)
    target_seg: (N, H, W) labels (0 = background, 1 = foreground)
    """
    n, c, h, w = prediction.shape
    assert c == 2, "prediction must have 2 channels (bg, fg)"
    hw = h * w

    tgt = target_seg.reshape(n, hw)
    if tgt.dtype.itemsize != 4:
        # Keep native 32-bit targets as-is (no wrapper upcast / extra traffic);
        # only widen bool / int8 / int64 etc. for layout safety.
        tgt = tgt.astype(jnp.int32)

    pred = prediction.reshape(n, 2, hw)           # free, contiguous reshape

    hw_pad = hw
    if hw % _LANE != 0:
        # TODO(synk): rare unaligned-HW fallback still pads pred/target in HBM
        # (one extra pass over pred); padded logits -> sigmoid 0, padded label
        # 2 -> neither class, so padding contributes nothing to any sum.
        hw_pad = _round_up(hw, _LANE)
        pred = jnp.pad(pred, ((0, 0), (0, 0), (0, hw_pad - hw)),
                       constant_values=-1e4)
        tgt = jnp.pad(tgt, ((0, 0), (0, hw_pad - hw)), constant_values=2)

    # Free merge: row i = [bg logits (hw_pad) | fg logits (hw_pad)].
    pred2 = pred.reshape(n, 2 * hw_pad)

    # Row tile: dtype-aware (bf16 native sublane tile is 16).
    base_tn = 16 if pred2.dtype.itemsize == 2 else 8
    tn = n if n < base_tn else base_tn
    n_tiles = pl.cdiv(n, tn)

    # HW tiling: pick a multiple-of-128 divisor of the (per super-block) lane
    # count, as large as allowed, so j-steps are big and exactly cover HW.
    m = hw_pad // _LANE
    if force_hw_split is None:
        split = (n_tiles == 1) and (m % 2 == 0) and (hw_pad >= 65536)
    else:
        split = bool(force_hw_split) and (m % 2 == 0)
    s_blocks = 2 if split else 1                  # parallel HW super-blocks
    m_per = m // s_blocks
    d = _largest_divisor_leq(m_per, max(1, max_block_lanes // _LANE))
    thw = d * _LANE
    jpb = m_per // d                              # j-steps per super-block
    hw_blocks = m // d                            # lane-blocks per channel
    rows = n_tiles * tn

    part = pl.pallas_call(
        _dice_partial_kernel,
        out_shape=jax.ShapeDtypeStruct((s_blocks, rows, 4), jnp.float32),
        grid=(n_tiles, s_blocks, jpb),
        in_specs=[
            # Same HBM array, two windows: bg half and fg half of each row.
            pl.BlockSpec((tn, thw), lambda i, sb, j: (i, sb * jpb + j)),
            pl.BlockSpec((tn, thw), lambda i, sb, j: (i, hw_blocks + sb * jpb + j)),
            pl.BlockSpec((tn, thw), lambda i, sb, j: (i, sb * jpb + j)),
        ],
        out_specs=pl.BlockSpec((1, tn, 4), lambda i, sb, j: (sb, i, 0)),
        compiler_params=pltpu.CompilerParams(
            dimension_semantics=("parallel", "parallel", "arbitrary"),
            vmem_limit_bytes=48 * 1024 * 1024),
    )(pred2, pred2, tgt)

    # Tiny epilogue in JAX: combine super-block partials, form the dice ratio.
    sums = jnp.sum(part, axis=0)[:n]                      # (n, 4)
    den = jnp.stack([sums[:, 0], sums[:, 2]], axis=1)     # (n, 2) [bg, fg]
    num = jnp.stack([sums[:, 1], sums[:, 3]], axis=1)
    loss = (1.0 - 2.0 * num / jnp.maximum(den, eps)) * weighted_val

    if reduction == "sum":
        return jnp.sum(loss) / n
    if reduction == "mean":
        return jnp.mean(loss)
    if reduction == "none":
        # torch ordering: [n0_bg, n0_fg, n1_bg, n1_fg, ...]
        return loss.reshape(-1)
    raise ValueError(f"unknown reduction: {reduction}")


def _reference_jax(prediction, target_seg, weighted_val=1.0,
                   reduction="sum", eps=1e-8):
    # Pure-JAX transcription of the torch code, for validation.
    t_fg = (target_seg == 1)
    t_bg = (target_seg == 0)
    tgt = jnp.stack([t_bg, t_fg], axis=1).astype(jnp.float32)
    n, _, h, w = tgt.shape
    pred = jax.nn.sigmoid(prediction.astype(jnp.float32).reshape(-1, h * w))
    tgt = tgt.reshape(-1, h * w)
    loss_part = jnp.sum(pred ** 2, axis=-1) + jnp.sum(tgt ** 2, axis=-1)
    loss = 1 - 2 * jnp.sum(tgt * pred, axis=-1) / jnp.maximum(loss_part, eps)
    loss = loss * weighted_val
    if reduction == "sum":
        return jnp.sum(loss) / n
    elif reduction == "mean":
        return jnp.mean(loss)
    return loss


if __name__ == "__main__":
    key = jax.random.PRNGKey(0)
    k1, k2 = jax.random.split(key)

    def check(pred, tgt, wv, red, **kw):
        out = jax.block_until_ready(
            weighted_dice_loss_pallas(pred, tgt, wv, red, **kw))
        ref = _reference_jax(pred, tgt, wv, red)
        assert out.shape == ref.shape, (out.shape, ref.shape)
        assert jnp.allclose(out, ref, rtol=1e-4, atol=1e-5), (red, out, ref)

    # 1) small aligned shape, all reductions
    p1 = jax.random.normal(k1, (2, 2, 16, 16), dtype=jnp.float32)
    t1 = jax.random.randint(k2, (2, 16, 16), 0, 2, dtype=jnp.int32)
    for red in ("sum", "mean", "none"):
        check(p1, t1, 0.5, red)

    # 2) unaligned HW (pad fallback) + batch not a power of two
    p2 = jax.random.normal(k1, (3, 2, 20, 20), dtype=jnp.float32)
    t2 = jax.random.randint(k2, (3, 20, 20), 0, 2, dtype=jnp.int32)
    check(p2, t2, 1.0, "sum")

    # 3) uneven row tiling (n=12, tn=8 -> masked edge block)
    p3 = jax.random.normal(k1, (12, 2, 16, 16), dtype=jnp.float32)
    t3 = jax.random.randint(k2, (12, 16, 16), 0, 2, dtype=jnp.int32)
    check(p3, t3, 1.0, "none")

    # 4) multi-step HW reduction (several j-steps per row tile)
    p4 = jax.random.normal(k1, (2, 2, 128, 128), dtype=jnp.float32)
    t4 = jax.random.randint(k2, (2, 128, 128), 0, 2, dtype=jnp.int32)
    check(p4, t4, 1.0, "sum", max_block_lanes=4096)

    # 5) HW super-block split (v7x megacore path) + multi-step
    p5 = jax.random.normal(k1, (1, 2, 128, 128), dtype=jnp.float32)
    t5 = jax.random.randint(k2, (1, 128, 128), 0, 2, dtype=jnp.int32)
    check(p5, t5, 1.0, "sum", max_block_lanes=2048, force_hw_split=True)

    # 6) bf16 prediction with 16-row tiles
    p6 = jax.random.normal(k1, (16, 2, 16, 16), dtype=jnp.float32).astype(jnp.bfloat16)
    t6 = jax.random.randint(k2, (16, 16, 16), 0, 2, dtype=jnp.int32)
    check(p6, t6, 1.0, "mean")

    print("KERNEL_OK")
</pallas_src>

<mosaic_0001>
module attributes {stable_mosaic.version = 11 : i64} {
  func.func @_dice_partial_kernel(%arg0: i32, %arg1: i32, %arg2: i32, %arg3: memref<2x256xf32, #tpu.memory_space<vmem>>, %arg4: memref<2x256xf32, #tpu.memory_space<vmem>>, %arg5: memref<2x256xi32, #tpu.memory_space<vmem>>, %arg6: memref<1x2x4xf32, #tpu.memory_space<vmem>>) attributes {dimension_semantics = [#tpu.dimension_semantics<parallel>, #tpu.dimension_semantics<parallel>, #tpu.dimension_semantics<arbitrary>], iteration_bounds = array<i64: 1, 1, 1>, scalar_prefetch = 0 : i64, scratch_operands = 0 : i64, tpu.core_type = #tpu.core_type<tc>, window_params = [{transform_indices = @transform_0, window_bounds = array<i64: 2, 256>}, {transform_indices = @transform_1, window_bounds = array<i64: 2, 256>}, {transform_indices = @transform_2, window_bounds = array<i64: 2, 256>}, {transform_indices = @transform_3, window_bounds = array<i64: 1, 2, 4>}]} {
    %c0_i32 = arith.constant 0 : i32
    %0 = arith.cmpi eq, %arg2, %c0_i32 : i32
    %1 = arith.extui %0 : i1 to i32
    %c0_i32_0 = arith.constant 0 : i32
    %2 = arith.cmpi ne, %1, %c0_i32_0 : i32
    scf.if %2 {
      %cst_37 = arith.constant 0.000000e+00 : f32
      %66 = vector.broadcast %cst_37 : f32 to vector<1x2x4xf32>
      %c0_38 = arith.constant 0 : index
      %c0_39 = arith.constant 0 : index
      %c0_40 = arith.constant 0 : index
      %67 = vector.load %arg6[%c0_38, %c0_39, %c0_40] : memref<1x2x4xf32, #tpu.memory_space<vmem>>, vector<1x2x4xf32>
      tpu.vector_store %arg6[%c0_38, %c0_39, %c0_40], %66 {strides = array<i32>} : memref<1x2x4xf32, #tpu.memory_space<vmem>>, vector<1x2x4xf32>,
    } else {
    }
    %c0 = arith.constant 0 : index
    %c0_1 = arith.constant 0 : index
    %3 = vector.load %arg3[%c0, %c0_1] : memref<2x256xf32, #tpu.memory_space<vmem>>, vector<2x256xf32>
    %cst = arith.constant 5.000000e-01 : f32
    %4 = vector.broadcast %cst : f32 to vector<2x256xf32>
    %5 = arith.mulf %4, %3 : vector<2x256xf32>
    %6 = math.tanh %5 : vector<2x256xf32>
    %cst_2 = arith.constant 5.000000e-01 : f32
    %7 = vector.broadcast %cst_2 : f32 to vector<2x256xf32>
    %8 = arith.mulf %7, %6 : vector<2x256xf32>
    %cst_3 = arith.constant 5.000000e-01 : f32
    %9 = vector.broadcast %cst_3 : f32 to vector<2x256xf32>
    %10 = arith.addf %8, %9 : vector<2x256xf32>
    %c0_4 = arith.constant 0 : index
    %c0_5 = arith.constant 0 : index
    %11 = vector.load %arg4[%c0_4, %c0_5] : memref<2x256xf32, #tpu.memory_space<vmem>>, vector<2x256xf32>
    %cst_6 = arith.constant 5.000000e-01 : f32
    %12 = vector.broadcast %cst_6 : f32 to vector<2x256xf32>
    %13 = arith.mulf %12, %11 : vector<2x256xf32>
    %14 = math.tanh %13 : vector<2x256xf32>
    %cst_7 = arith.constant 5.000000e-01 : f32
    %15 = vector.broadcast %cst_7 : f32 to vector<2x256xf32>
    %16 = arith.mulf %15, %14 : vector<2x256xf32>
    %cst_8 = arith.constant 5.000000e-01 : f32
    %17 = vector.broadcast %cst_8 : f32 to vector<2x256xf32>
    %18 = arith.addf %16, %17 : vector<2x256xf32>
    %c0_9 = arith.constant 0 : index
    %c0_10 = arith.constant 0 : index
    %19 = vector.load %arg5[%c0_9, %c0_10] : memref<2x256xi32, #tpu.memory_space<vmem>>, vector<2x256xi32>
    %c0_i32_11 = arith.constant 0 : i32
    %20 = vector.broadcast %c0_i32_11 : i32 to vector<2x256xi32>
    %21 = arith.cmpi eq, %19, %20 : vector<2x256xi32>
    %22 = arith.extui %21 : vector<2x256xi1> to vector<2x256xi32>
    %23 = arith.sitofp %22 : vector<2x256xi32> to vector<2x256xf32>
    %c1_i32 = arith.constant 1 : i32
    %24 = vector.broadcast %c1_i32 : i32 to vector<2x256xi32>
    %25 = arith.cmpi eq, %19, %24 : vector<2x256xi32>
    %26 = arith.extui %25 : vector<2x256xi1> to vector<2x256xi32>
    %27 = arith.sitofp %26 : vector<2x256xi32> to vector<2x256xf32>
    %28 = arith.mulf %10, %10 : vector<2x256xf32>
    %29 = arith.addf %28, %23 : vector<2x256xf32>
    %cst_12 = arith.constant dense<0.000000e+00> : vector<2xf32>
    %30 = vector.multi_reduction <add>, %29, %cst_12 [1] : vector<2x256xf32> to vector<2xf32>
    %31 = vector.shape_cast %30 : vector<2xf32> to vector<2x1xf32>
    %32 = arith.mulf %23, %10 : vector<2x256xf32>
    %cst_13 = arith.constant dense<0.000000e+00> : vector<2xf32>
    %33 = vector.multi_reduction <add>, %32, %cst_13 [1] : vector<2x256xf32> to vector<2xf32>
    %34 = vector.shape_cast %33 : vector<2xf32> to vector<2x1xf32>
    %35 = arith.mulf %18, %18 : vector<2x256xf32>
    %36 = arith.addf %35, %27 : vector<2x256xf32>
    %cst_14 = arith.constant dense<0.000000e+00> : vector<2xf32>
    %37 = vector.multi_reduction <add>, %36, %cst_14 [1] : vector<2x256xf32> to vector<2xf32>
    %38 = vector.shape_cast %37 : vector<2xf32> to vector<2x1xf32>
    %39 = arith.mulf %27, %18 : vector<2x256xf32>
    %cst_15 = arith.constant dense<0.000000e+00> : vector<2xf32>
    %40 = vector.multi_reduction <add>, %39, %cst_15 [1] : vector<2x256xf32> to vector<2xf32>
    %41 = vector.shape_cast %40 : vector<2xf32> to vector<2x1xf32>
    %c0_16 = arith.constant 0 : index
    %c0_17 = arith.constant 0 : index
    %c0_18 = arith.constant 0 : index
    %42 = vector.load %arg6[%c0_16, %c0_17, %c0_18] : memref<1x2x4xf32, #tpu.memory_space<vmem>>, vector<1x2x1xf32>
    %43 = vector.shape_cast %42 : vector<1x2x1xf32> to vector<2x1xf32>
    %44 = arith.addf %43, %31 : vector<2x1xf32>
    %c0_19 = arith.constant 0 : index
    %c0_20 = arith.constant 0 : index
    %c0_21 = arith.constant 0 : index
    %45 = vector.load %arg6[%c0_19, %c0_20, %c0_21] : memref<1x2x4xf32, #tpu.memory_space<vmem>>, vector<1x2x1xf32>
    %46 = vector.shape_cast %45 : vector<1x2x1xf32> to vector<2x1xf32>
    %47 = vector.shape_cast %44 : vector<2x1xf32> to vector<1x2x1xf32>
    tpu.vector_store %arg6[%c0_19, %c0_20, %c0_21], %47 {strides = array<i32>} : memref<1x2x4xf32, #tpu.memory_space<vmem>>, vector<1x2x1xf32>,
    %c0_22 = arith.constant 0 : index
    %c0_23 = arith.constant 0 : index
    %c1 = arith.constant 1 : index
    %48 = vector.load %arg6[%c0_22, %c0_23, %c1] : memref<1x2x4xf32, #tpu.memory_space<vmem>>, vector<1x2x1xf32>
    %49 = vector.shape_cast %48 : vector<1x2x1xf32> to vector<2x1xf32>
    %50 = arith.addf %49, %34 : vector<2x1xf32>
    %c0_24 = arith.constant 0 : index
    %c0_25 = arith.constant 0 : index
    %c1_26 = arith.constant 1 : index
    %51 = vector.load %arg6[%c0_24, %c0_25, %c1_26] : memref<1x2x4xf32, #tpu.memory_space<vmem>>, vector<1x2x1xf32>
    %52 = vector.shape_cast %51 : vector<1x2x1xf32> to vector<2x1xf32>
    %53 = vector.shape_cast %50 : vector<2x1xf32> to vector<1x2x1xf32>
    tpu.vector_store %arg6[%c0_24, %c0_25, %c1_26], %53 {strides = array<i32>} : memref<1x2x4xf32, #tpu.memory_space<vmem>>, vector<1x2x1xf32>,
    %c0_27 = arith.constant 0 : index
    %c0_28 = arith.constant 0 : index
    %c2 = arith.constant 2 : index
    %54 = vector.load %arg6[%c0_27, %c0_28, %c2] : memref<1x2x4xf32, #tpu.memory_space<vmem>>, vector<1x2x1xf32>
    %55 = vector.shape_cast %54 : vector<1x2x1xf32> to vector<2x1xf32>
    %56 = arith.addf %55, %38 : vector<2x1xf32>
    %c0_29 = arith.constant 0 : index
    %c0_30 = arith.constant 0 : index
    %c2_31 = arith.constant 2 : index
    %57 = vector.load %arg6[%c0_29, %c0_30, %c2_31] : memref<1x2x4xf32, #tpu.memory_space<vmem>>, vector<1x2x1xf32>
    %58 = vector.shape_cast %57 : vector<1x2x1xf32> to vector<2x1xf32>
    %59 = vector.shape_cast %56 : vector<2x1xf32> to vector<1x2x1xf32>
    tpu.vector_store %arg6[%c0_29, %c0_30, %c2_31], %59 {strides = array<i32>} : memref<1x2x4xf32, #tpu.memory_space<vmem>>, vector<1x2x1xf32>,
    %c0_32 = arith.constant 0 : index
    %c0_33 = arith.constant 0 : index
    %c3 = arith.constant 3 : index
    %60 = vector.load %arg6[%c0_32, %c0_33, %c3] : memref<1x2x4xf32, #tpu.memory_space<vmem>>, vector<1x2x1xf32>
    %61 = vector.shape_cast %60 : vector<1x2x1xf32> to vector<2x1xf32>
    %62 = arith.addf %61, %41 : vector<2x1xf32>
    %c0_34 = arith.constant 0 : index
    %c0_35 = arith.constant 0 : index
    %c3_36 = arith.constant 3 : index
    %63 = vector.load %arg6[%c0_34, %c0_35, %c3_36] : memref<1x2x4xf32, #tpu.memory_space<vmem>>, vector<1x2x1xf32>
    %64 = vector.shape_cast %63 : vector<1x2x1xf32> to vector<2x1xf32>
    %65 = vector.shape_cast %62 : vector<2x1xf32> to vector<1x2x1xf32>
    tpu.vector_store %arg6[%c0_34, %c0_35, %c3_36], %65 {strides = array<i32>} : memref<1x2x4xf32, #tpu.memory_space<vmem>>, vector<1x2x1xf32>,
    return
  }
  func.func @transform_0(%arg0: i32, %arg1: i32, %arg2: i32) -> (i32, i32) {
    %c1_i32 = arith.constant 1 : i32
    %0 = arith.muli %arg1, %c1_i32 : i32
    %1 = arith.addi %0, %arg2 : i32
    %c0_i32 = arith.constant 0 : i32
    return %arg0, %1 : i32, i32
  }
  func.func @transform_1(%arg0: i32, %arg1: i32, %arg2: i32) -> (i32, i32) {
    %c1_i32 = arith.constant 1 : i32
    %0 = arith.muli %arg1, %c1_i32 : i32
    %c1_i32_0 = arith.constant 1 : i32
    %1 = arith.addi %c1_i32_0, %0 : i32
    %2 = arith.addi %1, %arg2 : i32
    %c0_i32 = arith.constant 0 : i32
    return %arg0, %2 : i32, i32
  }
  func.func @transform_2(%arg0: i32, %arg1: i32, %arg2: i32) -> (i32, i32) {
    %c1_i32 = arith.constant 1 : i32
    %0 = arith.muli %arg1, %c1_i32 : i32
    %1 = arith.addi %0, %arg2 : i32
    %c0_i32 = arith.constant 0 : i32
    return %arg0, %1 : i32, i32
  }
  func.func @transform_3(%arg0: i32, %arg1: i32, %arg2: i32) -> (i32, i32, i32) {
    %c0_i32 = arith.constant 0 : i32
    %c0_i32_0 = arith.constant 0 : i32
    return %arg1, %arg0, %c0_i32 : i32, i32, i32
  }
}

</mosaic_0001>

<bundles_post_ra>
// kernel: tpu_custom_call.1
= control target key start
LH: loop header
LB: loop body
LE: loop exit
PB: predicated region body
PF: predicated region fallthrough
CT: control target
= control target key end

     0   :  { %8 = vsyncpa [#allocation3], 0  ;;  %s372_s0 = inlined_call_operand.hbm [shape: f32[2,512], index: 0, kind: input, shape index: {}]   ;;  %s373_s1 = inlined_call_operand.hbm [shape: f32[2,512], index: 1, kind: input, shape index: {}]   ;;  %s374_s2 = inlined_call_operand.vmem [shape: s32[2,256], index: 2, kind: input, shape index: {}]   ;;  %s375_s3 = inlined_call_operand.hbm [shape: f32[1,2,4], index: 3, kind: output, shape index: {}]  }
   0x1   :  { %9 = vsyncpa [#allocation6], 0 }
   0x2   :  { %10 = vsyncpa [#allocation4], 0  ;;  %s322_s14 = scalar_lea.hbm %s373_s1, 64  ;;  %s294_s15 = smov [#allocation2]  }
   0x3   :  { %s21_s16 = sshll.u32 %s294_s15, 4  ;;  %s295_s17 = smov [#allocation5]   ;;  %s22_s16 = int_to_ptr.vmem [resolvable:$true] %s21_s16 }
   0x4   :  { %s36_s18 = sshll.u32 %s295_s17, 4  ;;  %s219_s21 = scalar_lea.hbm %s372_s0, 64  ;;  %s37_s18 = int_to_ptr.vmem [resolvable:$true] %s36_s18 }
   0x5   :  { %p220_p0 = scmp.ne.s32.totalorder %s372_s0, %s219_s21  ;;  %s221_s26 = scalar_lea.hbm %s372_s0, 128 }
   0x6   :  { %p222_p1 = scmp.lt.u32.totalorder %s221_s26, %s219_s21  ;;  %p223_p2 = scmp.lt.u32.totalorder %s219_s21, %s372_s0 }
   0x8   :  { %p224_p3 = por %p223_p2, %p222_p1 }
   0xa   :  { %p225_p4 = pnand %p224_p3, %p220_p0 }
   0xc   :  { %228 = shalt.err (!%p225_p4)
}
   0xd   :  { %s229_s29 = scalar_lea.vmem %s22_s16, 64  ;;  %p234_p6 = scmp.lt.s32.totalorder %s22_s16, %s22_s16 }
   0xe   :  { %p230_p5 = scmp.ne.s32.totalorder %s22_s16, %s229_s29  ;;  %p235_p7 = scmp.lt.s32.totalorder %s229_s29, %s229_s29 }
  0x10   :  { %p236_p8 = por %p235_p7, %p234_p6 }
  0x12   :  { %p237_p9 = pnand %p236_p8, %p230_p5 }
  0x14   :  { %240 = shalt.err (!%p237_p9)
}
  0x15   :  { %24 = dma.hbm_to_vmem [thread:$0]  %s372_s0, 64, %s22_s16, [#allocation3]  }
  0x16   :  { %s265_s7 = scalar_lea.hbm %s373_s1, 128  ;;  %p244_p11 = scmp.lt.u32.totalorder %s322_s14, %s373_s1 }
  0x17   :  { %p242_p10 = scmp.ne.s32.totalorder %s322_s14, %s265_s7  ;;  %p245_p12 = scmp.lt.u32.totalorder %s265_s7, %s265_s7 }
  0x18   :  { %p247_p0 = scmp.lt.u32.totalorder %s265_s7, %s322_s14 }
  0x19   :  { %p246_p13 = por %p245_p12, %p244_p11 }
  0x1b   :  { %p248_p1 = por %p247_p0, %p246_p13 }
  0x1d   :  { %p249_p2 = pnand %p248_p1, %p242_p10 }
  0x1f   :  { %252 = shalt.err (!%p249_p2)
}
  0x20   :  { %s253_s10 = scalar_lea.vmem %s37_s18, 64  ;;  %p258_p4 = scmp.lt.s32.totalorder %s37_s18, %s37_s18 }
  0x21   :  { %p254_p3 = scmp.ne.s32.totalorder %s37_s18, %s253_s10  ;;  %p259_p5 = scmp.lt.s32.totalorder %s253_s10, %s253_s10 }
  0x23   :  { %p260_p6 = por %p259_p5, %p258_p4 }
  0x25   :  { %p261_p7 = pnand %p260_p6, %p254_p3 }
  0x27   :  { %264 = shalt.err (!%p261_p7)
}
  0x28   :  { %39 = dma.hbm_to_vmem [thread:$0]  %s322_s14, 64, %s37_s18, [#allocation6]  }
  0x29   :  { %288 = dma.done.wait [#allocation3], 64  }
  0x2a   :  { %289 = vsyncadd [#allocation3], 4294967232 }
  0x2b   :  { %290 = dma.done.wait [#allocation6], 64  }
  0x2c   :  { %291 = vsyncadd [#allocation6], 4294967232  ;;  %vm79_vm0 = vcmask 25600   ;;  %v296_v0 = vmov 0.0   ;;  %v81_v1 = vld [vmem:[#allocation2] sm:$0xf]  ;;  %v104_v7 = vlaneseq }
  0x2d   :  { %80 = vst.msk [vmem:[#allocation7] sm:$0x3] %vm79_vm0, %v296_v0  ;;  %v86_v2 = vld [vmem:[#allocation5] sm:$0xf]  ;;  %v82_v3 = vmul.f32 0.5, %v81_v1  ;;  %vm111_vm3 = vcmask 1041408  }
  0x2e   :  { %v87_v4 = vmul.f32 0.5, %v86_v2  ;;  %v297_v5 = vmov 1983009808   ;;  %v91_v8 = vld [vmem:[%s374_s2] sm:$0xf]  ;;  %v105_v13 = vshrl.u32 %v104_v7, 7 }
  0x2f   :  { %215 = vtanh.f32 %v82_v3  ;;  %v102_v6 = vunpack.c.l.s4 %v297_v5  ;;  %vm92_vm1 = vcmp.eq.s32.totalorder %v91_v8, 0  ;;  %vm95_vm2 = vcmp.eq.s32.totalorder %v91_v8, 1  ;;  %s298_s2 = smov [#allocation7]  }
  0x30   :  { %217 = vtanh.f32 %v87_v4  ;;  %v208_v16 = vsel %vm92_vm1, 1.0, %v296_v0  ;;  %v209_v21 = vsel %vm95_vm2, 1.0, %v296_v0  ;;  %vm171_vm4 = vcmask 1024   ;;  %s191_s11 = sshll.u32 %s298_s2, 4  ;;  %s192_s11 = int_to_ptr.vmem [resolvable:$true] %s191_s11 }
  0x31   :  { %v103_v12 = vunpack.c.0.s8 %v102_v6  ;;  %vm175_vm5 = vcmask 9224   ;;  %vm179_vm6 = vcmask 17424   ;;  %vm183_vm7 = vcmask 25624   ;;  %s266_s12 = scalar_lea.vmem %s192_s11, 32  ;;  %p271_p9 = scmp.lt.s32.totalorder %s192_s11, %s192_s11 }
  0x32   :  { %p267_p8 = scmp.ne.s32.totalorder %s192_s11, %s266_s12  ;;  %p272_p10 = scmp.lt.s32.totalorder %s266_s12, %s266_s12 }
  0x33   :  { %v106_v19 = vsub.s32 %v103_v12, %v105_v13 }
  0x34   :  { %v169_v46 = vld [vmem:[#allocation7] sm:$0x3]  ;;  %p273_p11 = por %p272_p10, %p271_p9 }
  0x36   :  { %p274_p12 = pnand %p273_p11, %p267_p8 }
  0x39   :  { %v216_v9 = vpop.eup %215 }
  0x3a   :  { %v218_v10 = vpop.eup %217  ;;  %v84_v11 = vmul.f32 0.5, %v216_v9 }
  0x3b   :  { %v89_v14 = vmul.f32 0.5, %v218_v10 }
  0x3c   :  { %v85_v15 = vadd.f32 0.5, %v84_v11 }
  0x3d   :  { %v90_v17 = vadd.f32 0.5, %v89_v14 }
  0x3e   :  { %v98_v18 = vmul.f32 %v85_v15, %v85_v15  ;;  %v117_v20 = vmul.f32 %v208_v16, %v85_v15 }
  0x3f   :  { %v134_v22 = vmul.f32 %v90_v17, %v90_v17  ;;  %v152_v23 = vmul.f32 %v209_v21, %v90_v17 }
  0x40   :  { %v99_v24 = vadd.f32 %v208_v16, %v98_v18  ;;  %v125_v25 = vrot.slane %v117_v20, %v106_v19 }
  0x41   :  { %v135_v26 = vadd.f32 %v209_v21, %v134_v22  ;;  %v160_v27 = vrot.slane %v152_v23, %v106_v19 }
  0x42   :  { %v107_v28 = vrot.slane %v99_v24, %v106_v19  ;;  %v126_v29 = vcombine.high %v125_v25, %v125_v25  ;;  %v129_v37 = vsel %vm111_vm3, %v125_v25, 0.0 }
  0x43   :  { %v143_v30 = vrot.slane %v135_v26, %v106_v19  ;;  %v161_v31 = vcombine.high %v160_v27, %v160_v27  ;;  %v164_v41 = vsel %vm111_vm3, %v160_v27, 0.0 }
  0x44   :  { %v108_v32 = vcombine.high %v107_v28, %v107_v28  ;;  %v112_v33 = vsel %vm111_vm3, %v107_v28, 0.0  ;;  %v130_v38 = vsel %vm111_vm3, %v126_v29, 0.0 }
  0x45   :  { %v144_v34 = vcombine.high %v143_v30, %v143_v30  ;;  %v147_v35 = vsel %vm111_vm3, %v143_v30, 0.0  ;;  %v165_v42 = vsel %vm111_vm3, %v161_v31, 0.0  ;;  %v131_v44 = vadd.f32 %v130_v38, %v129_v37 }
  0x46   :  { %v113_v36 = vsel %vm111_vm3, %v108_v32, 0.0  ;;  %v166_v45 = vadd.f32 %v165_v42, %v164_v41 }
  0x47   :  { %v114_v39 = vadd.f32 %v113_v36, %v112_v33  ;;  %v148_v40 = vsel %vm111_vm3, %v144_v34, 0.0 }
  0x48   :  { %v149_v43 = vadd.f32 %v148_v40, %v147_v35 }
  0x49   :  { %115 = vadd.xlane.f32.xlu0 %v114_v39 }
  0x4a   :  { %150 = vadd.xlane.f32.xlu1 %v149_v43 }
  0x4d   :  { %132 = vadd.xlane.f32.xlu0 %v131_v44 }
  0x4e   :  { %167 = vadd.xlane.f32.xlu1 %v166_v45 }
  0xd6   :  { %v116_v47 = vpop.xlane.xlu0 %115 }
  0xd7   :  { %v170_v48 = vadd.f32 %v169_v46, %v116_v47  ;;  %v151_v52 = vpop.xlane.xlu1 %150 }
  0xd9   :  { %172 = vst.msk [vmem:[#allocation7] sm:$0x3] %vm171_vm4, %v170_v48 }
  0xda   :  { %v133_v49 = vpop.xlane.xlu0 %132 }
  0xdb   :  { %v168_v55 = vpop.xlane.xlu1 %167 }
  0xe0   :  { %v173_v50 = vld [vmem:[#allocation7] sm:$0x3] }
  0xe1   :  { %v174_v51 = vadd.f32 %v173_v50, %v133_v49 }
  0xe3   :  { %176 = vst.msk [vmem:[#allocation7] sm:$0x3] %vm175_vm5, %v174_v51 }
  0xea   :  { %v177_v53 = vld [vmem:[#allocation7] sm:$0x3] }
  0xeb   :  { %v178_v54 = vadd.f32 %v177_v53, %v151_v52 }
  0xed   :  { %180 = vst.msk [vmem:[#allocation7] sm:$0x3] %vm179_vm6, %v178_v54 }
  0xf4   :  { %v181_v56 = vld [vmem:[#allocation7] sm:$0x3] }
  0xf5   :  { %v182_v57 = vadd.f32 %v181_v56, %v168_v55 }
  0xf7   :  { %184 = vst.msk [vmem:[#allocation7] sm:$0x3] %vm183_vm7, %v182_v57 }
  0xf8   :  { %277 = shalt.err (!%p274_p12)
}
  0xf9   :  { %s278_s15 = scalar_lea.hbm %s375_s3, 32 }
  0xfa   :  { %p279_p13 = scmp.ne.s32.totalorder %s375_s3, %s278_s15  ;;  %p282_p0 = scmp.lt.u32.totalorder %s278_s15, %s375_s3 }
  0xfc   :  { %p284_p1 = pnand %p282_p0, %p279_p13 }
  0xfe   :  { %287 = shalt.err (!%p284_p1)
}
  0xff   :  { %194 = dma.vmem_to_hbm [thread:$0]  %s192_s11, 32, %s375_s3, [#allocation4]  }
 0x100   :  { %292 = dma.done.wait [#allocation4], 32  }
 0x101   :  { %293 = vsyncadd [#allocation4], 4294967264 }
 0x102   :  { %198 = vsyncpa [#allocation3], 1 }
 0x103   :  { %199 = vsyncpa [#allocation6], 1 }
 0x104   :  { %200 = vsyncpa [#allocation4], 1 }

</bundles_post_ra>
